<compile_context>
chip_gen: v6e
topology: v6e:2x2x1
jax: 0.10.0
libtpu: 0.0.40
codegen_flags: <defaults>
</compile_context>

<pallas_src>
import math
import functools

import jax
import jax.numpy as jnp
from jax import lax
from jax.experimental import pallas as pl
from jax.experimental.pallas import tpu as pltpu


# ----------------------------------------------------------------------------
# Kernel: one batch element per grid step
# ----------------------------------------------------------------------------
def _personalized_attention_kernel(x_ref, wq_ref, wk_ref, wv_ref,
                                   pq_ref, pk_ref, bias_ref, o_ref, *, scale):
    """
    x_ref   : (1, T, E)  tokens for this batch element
    wq/wk   : (E, K)     projection weights (resident across the grid)
    wv_ref  : (E, V)
    pq/pk   : (1, 1, K)  additive personalization (zeros in 'prefix' mode)
    bias    : (1, 1, T)  additive attention mask: 0 = keep, -inf = masked
    o_ref   : (1, T, V)
    """
    x = x_ref[0]                                                      # (T, E)

    # QKV projections on the MXU, f32 accumulation.
    q = jnp.dot(x, wq_ref[...], preferred_element_type=jnp.float32) + pq_ref[0]
    k = jnp.dot(x, wk_ref[...], preferred_element_type=jnp.float32) + pk_ref[0]
    v = jnp.dot(x, wv_ref[...], preferred_element_type=jnp.float32)
    q = q * scale                                                     # /sqrt(K)

    # scores[t, s] = q[t] . k[s] -- contract on hidden dim, no explicit transpose.
    s = lax.dot_general(q, k, (((1,), (1,)), ((), ())),
                        preferred_element_type=jnp.float32)           # (T, T)
    s = s + bias_ref[0]                                               # + (1, T)

    # numerically stable softmax along keys (matches F.softmax / masked_fill -inf)
    m = jnp.max(s, axis=-1, keepdims=True)
    p = jnp.exp(s - m)
    attn = p / jnp.sum(p, axis=-1, keepdims=True)

    ctx = jnp.dot(attn, v, preferred_element_type=jnp.float32)        # (T, V)
    o_ref[0] = ctx.astype(o_ref.dtype)


# ----------------------------------------------------------------------------
# Wrapper (embedding lookup / prefix concat / mask bias are cheap JAX glue)
# ----------------------------------------------------------------------------
def personalized_simple_attention(x, wq, wk, wv, pkeys_emb, pqueries_emb,
                                  person_idxs, mask=None,
                                  personalization_type="prefix"):
    """
    x            : (B, T, E) float32
    wq, wk       : (E, K)    (== torch Linear weight transposed)
    wv           : (E, V)
    pkeys_emb    : (n_persons, K) personalized_keys embedding table
    pqueries_emb : (n_persons, K) personalized_queries embedding table
    person_idxs  : (B,) int32
    mask         : (B, T) bool (True = attend) or None
    returns      : (B, T_out, V), T_out = T+1 for 'prefix'
    """
    B, T, E = x.shape
    K = wq.shape[1]
    V = wv.shape[1]
    assert wk.shape == (E, K) and wv.shape == (E, V)
    assert person_idxs.shape[0] == B

    pk = pkeys_emb[person_idxs]         # (B, K)   nn.Embedding lookup
    pq = pqueries_emb[person_idxs]      # (B, K)   (unused in 'prefix', as in torch)

    if mask is None:
        mask = jnp.ones((B, T), dtype=bool)

    if personalization_type == "prefix":
        assert E == K, "prefix mode requires key_hidden_size == emb_size"
        x = jnp.concatenate([pk[:, None, :].astype(x.dtype), x], axis=1)
        mask = jnp.concatenate([jnp.ones((B, 1), dtype=bool), mask], axis=1)
        T = T + 1
        pq_add = jnp.zeros((B, 1, K), dtype=jnp.float32)
        pk_add = jnp.zeros((B, 1, K), dtype=jnp.float32)
    elif personalization_type == "add":
        pq_add = pq[:, None, :].astype(jnp.float32)
        pk_add = pk[:, None, :].astype(jnp.float32)
    else:
        # TODO(synk): 'linear' (per-person nn.Linear picked by .item() in a Python
        # loop) and 'concat' (NotImplementedError upstream) are not ported.
        raise NotImplementedError(personalization_type)

    # additive mask bias: 0 where attended, -inf where masked (== masked_fill(-inf))
    bias = jnp.where(mask, 0.0, -jnp.inf).astype(jnp.float32)[:, None, :]  # (B,1,T)

    scale = 1.0 / math.sqrt(K)
    kernel = functools.partial(_personalized_attention_kernel, scale=scale)

    return pl.pallas_call(
        kernel,
        out_shape=jax.ShapeDtypeStruct((B, T, V), x.dtype),
        grid=(B,),
        in_specs=[
            pl.BlockSpec((1, T, E), lambda b: (b, 0, 0)),   # x: one batch row
            pl.BlockSpec((E, K), lambda b: (0, 0)),         # Wq: resident in VMEM
            pl.BlockSpec((E, K), lambda b: (0, 0)),         # Wk: resident in VMEM
            pl.BlockSpec((E, V), lambda b: (0, 0)),         # Wv: resident in VMEM
            pl.BlockSpec((1, 1, K), lambda b: (b, 0, 0)),   # personalized query add
            pl.BlockSpec((1, 1, K), lambda b: (b, 0, 0)),   # personalized key add
            pl.BlockSpec((1, 1, T), lambda b: (b, 0, 0)),   # mask bias
        ],
        out_specs=pl.BlockSpec((1, T, V), lambda b: (b, 0, 0)),
        compiler_params=pltpu.CompilerParams(
            dimension_semantics=("parallel",),        # v7x megacore shards batch
            vmem_limit_bytes=48 * 1024 * 1024,        # stays under v7x's 64 MiB VMEM
        ),
    )(x, wq, wk, wv, pq_add, pk_add, bias)


# ----------------------------------------------------------------------------
# Pure-JAX reference (mirrors the PyTorch forward)
# ----------------------------------------------------------------------------
def _reference(x, wq, wk, wv, pkeys_emb, pqueries_emb, person_idxs, mask,
               personalization_type):
    B = x.shape[0]
    K = wq.shape[1]
    pk = pkeys_emb[person_idxs]
    pq = pqueries_emb[person_idxs]
    if personalization_type == "prefix":
        x = jnp.concatenate([pk[:, None, :], x], axis=1)
        mask = jnp.concatenate([jnp.ones((B, 1), dtype=bool), mask], axis=1)
    q = x @ wq
    k = x @ wk
    v = x @ wv
    if personalization_type == "add":
        q = q + pq[:, None, :]
        k = k + pk[:, None, :]
    q = q / math.sqrt(K)
    s = jnp.einsum("btk,bsk->bts", q, k)
    s = jnp.where(mask[:, None, :], s, -jnp.inf)
    a = jax.nn.softmax(s, axis=-1)
    return jnp.einsum("bts,bsv->btv", a, v)


# ----------------------------------------------------------------------------
if __name__ == "__main__":
    key = jax.random.PRNGKey(0)
    n_persons = 32
    B, T = 2, 8
    person_idxs = jnp.array([3, 17], dtype=jnp.int32)
    mask = jnp.array([[True] * 8, [True] * 6 + [False] * 2])   # (B, T) bool

    def init_linear(k, fan_in, fan_out):
        bound = 1.0 / math.sqrt(fan_in)
        return jax.random.uniform(k, (fan_in, fan_out), jnp.float32, -bound, bound)

    # --- config 1: default personalization_type='prefix' (requires E == K) ----
    E = K = V = 128
    ks = jax.random.split(key, 7)
    x = jax.random.normal(ks[0], (B, T, E), jnp.float32)
    wq = init_linear(ks[1], E, K)
    wk = init_linear(ks[2], E, K)
    wv = init_linear(ks[3], E, V)
    pkeys = jax.random.normal(ks[4], (n_persons, K), jnp.float32)
    pquer = jax.random.normal(ks[5], (n_persons, K), jnp.float32)

    out = personalized_simple_attention(x, wq, wk, wv, pkeys, pquer,
                                        person_idxs, mask, "prefix")
    out = jax.block_until_ready(out)
    ref = _reference(x, wq, wk, wv, pkeys, pquer, person_idxs, mask, "prefix")
    assert out.shape == (B, T + 1, V)
    assert jnp.allclose(out, ref, atol=1e-3, rtol=1e-3), "prefix mode mismatch"

    # --- config 2: 'add' personalization with the module's default sizes ------
    E2, K2, V2 = 128, 256, 256
    ks2 = jax.random.split(ks[6], 6)
    x2 = jax.random.normal(ks2[0], (B, T, E2), jnp.float32)
    wq2 = init_linear(ks2[1], E2, K2)
    wk2 = init_linear(ks2[2], E2, K2)
    wv2 = init_linear(ks2[3], E2, V2)
    pkeys2 = jax.random.normal(ks2[4], (n_persons, K2), jnp.float32) * 0.1
    pquer2 = jax.random.normal(ks2[5], (n_persons, K2), jnp.float32) * 0.1

    out2 = personalized_simple_attention(x2, wq2, wk2, wv2, pkeys2, pquer2,
                                         person_idxs, mask, "add")
    out2 = jax.block_until_ready(out2)
    ref2 = _reference(x2, wq2, wk2, wv2, pkeys2, pquer2, person_idxs, mask, "add")
    assert out2.shape == (B, T, V2)
    assert jnp.allclose(out2, ref2, atol=1e-3, rtol=1e-3), "add mode mismatch"

    print("KERNEL_OK")
</pallas_src>

<mosaic_0001>
module attributes {stable_mosaic.version = 11 : i64} {
  func.func @_personalized_attention_kernel(%arg0: i32, %arg1: memref<1x9x128xf32, #tpu.memory_space<vmem>>, %arg2: memref<128x128xf32, #tpu.memory_space<vmem>>, %arg3: memref<128x128xf32, #tpu.memory_space<vmem>>, %arg4: memref<128x128xf32, #tpu.memory_space<vmem>>, %arg5: memref<1x1x128xf32, #tpu.memory_space<vmem>>, %arg6: memref<1x1x128xf32, #tpu.memory_space<vmem>>, %arg7: memref<1x1x9xf32, #tpu.memory_space<vmem>>, %arg8: memref<1x9x128xf32, #tpu.memory_space<vmem>>) attributes {dimension_semantics = [#tpu.dimension_semantics<parallel>], iteration_bounds = array<i64: 2>, scalar_prefetch = 0 : i64, scratch_operands = 0 : i64, tpu.core_type = #tpu.core_type<tc>, window_params = [{transform_indices = @transform_0, window_bounds = array<i64: 1, 9, 128>}, {pipeline_mode = #tpu.pipeline_mode<synchronous>, transform_indices = @transform_1, window_bounds = array<i64: 128, 128>}, {pipeline_mode = #tpu.pipeline_mode<synchronous>, transform_indices = @transform_2, window_bounds = array<i64: 128, 128>}, {pipeline_mode = #tpu.pipeline_mode<synchronous>, transform_indices = @transform_3, window_bounds = array<i64: 128, 128>}, {transform_indices = @transform_4, window_bounds = array<i64: 1, 1, 128>}, {transform_indices = @transform_5, window_bounds = array<i64: 1, 1, 128>}, {transform_indices = @transform_6, window_bounds = array<i64: 1, 1, 9>}, {transform_indices = @transform_7, window_bounds = array<i64: 1, 9, 128>}]} {
    %c0 = arith.constant 0 : index
    %c0_0 = arith.constant 0 : index
    %c0_1 = arith.constant 0 : index
    %0 = vector.load %arg1[%c0, %c0_0, %c0_1] : memref<1x9x128xf32, #tpu.memory_space<vmem>>, vector<1x9x128xf32>
    %1 = vector.shape_cast %0 : vector<1x9x128xf32> to vector<9x128xf32>
    %c0_2 = arith.constant 0 : index
    %c0_3 = arith.constant 0 : index
    %2 = vector.load %arg2[%c0_2, %c0_3] : memref<128x128xf32, #tpu.memory_space<vmem>>, vector<128x128xf32>
    %cst = arith.constant dense<0.000000e+00> : vector<9x128xf32>
    %3 = tpu.matmul %1, %2, %cst {dimension_numbers = #tpu.dot_dimension_numbers<[1], [0], [0], [1], [0, 0, 1, 1], [], []>} : vector<9x128xf32>, vector<128x128xf32>, vector<9x128xf32> -> vector<9x128xf32>
    %c0_4 = arith.constant 0 : index
    %c0_5 = arith.constant 0 : index
    %c0_6 = arith.constant 0 : index
    %4 = vector.load %arg5[%c0_4, %c0_5, %c0_6] : memref<1x1x128xf32, #tpu.memory_space<vmem>>, vector<1x1x128xf32>
    %5 = vector.shape_cast %4 : vector<1x1x128xf32> to vector<1x128xf32>
    %6 = vector.broadcast %5 : vector<1x128xf32> to vector<9x128xf32>
    %7 = arith.addf %3, %6 : vector<9x128xf32>
    %c0_7 = arith.constant 0 : index
    %c0_8 = arith.constant 0 : index
    %8 = vector.load %arg3[%c0_7, %c0_8] : memref<128x128xf32, #tpu.memory_space<vmem>>, vector<128x128xf32>
    %cst_9 = arith.constant dense<0.000000e+00> : vector<9x128xf32>
    %9 = tpu.matmul %1, %8, %cst_9 {dimension_numbers = #tpu.dot_dimension_numbers<[1], [0], [0], [1], [0, 0, 1, 1], [], []>} : vector<9x128xf32>, vector<128x128xf32>, vector<9x128xf32> -> vector<9x128xf32>
    %c0_10 = arith.constant 0 : index
    %c0_11 = arith.constant 0 : index
    %c0_12 = arith.constant 0 : index
    %10 = vector.load %arg6[%c0_10, %c0_11, %c0_12] : memref<1x1x128xf32, #tpu.memory_space<vmem>>, vector<1x1x128xf32>
    %11 = vector.shape_cast %10 : vector<1x1x128xf32> to vector<1x128xf32>
    %12 = vector.broadcast %11 : vector<1x128xf32> to vector<9x128xf32>
    %13 = arith.addf %9, %12 : vector<9x128xf32>
    %c0_13 = arith.constant 0 : index
    %c0_14 = arith.constant 0 : index
    %14 = vector.load %arg4[%c0_13, %c0_14] : memref<128x128xf32, #tpu.memory_space<vmem>>, vector<128x128xf32>
    %cst_15 = arith.constant dense<0.000000e+00> : vector<9x128xf32>
    %15 = tpu.matmul %1, %14, %cst_15 {dimension_numbers = #tpu.dot_dimension_numbers<[1], [0], [0], [1], [0, 0, 1, 1], [], []>} : vector<9x128xf32>, vector<128x128xf32>, vector<9x128xf32> -> vector<9x128xf32>
    %cst_16 = arith.constant 0.0883883461 : f32
    %16 = vector.broadcast %cst_16 : f32 to vector<9x128xf32>
    %17 = arith.mulf %7, %16 : vector<9x128xf32>
    %cst_17 = arith.constant dense<0.000000e+00> : vector<9x9xf32>
    %18 = tpu.matmul %17, %13, %cst_17 {dimension_numbers = #tpu.dot_dimension_numbers<[1], [1], [0], [0], [0, 0, 1, 0], [], []>} : vector<9x128xf32>, vector<9x128xf32>, vector<9x9xf32> -> vector<9x9xf32>
    %c0_18 = arith.constant 0 : index
    %c0_19 = arith.constant 0 : index
    %c0_20 = arith.constant 0 : index
    %19 = vector.load %arg7[%c0_18, %c0_19, %c0_20] : memref<1x1x9xf32, #tpu.memory_space<vmem>>, vector<1x1x9xf32>
    %20 = vector.shape_cast %19 : vector<1x1x9xf32> to vector<1x9xf32>
    %21 = vector.broadcast %20 : vector<1x9xf32> to vector<9x9xf32>
    %22 = arith.addf %18, %21 : vector<9x9xf32>
    %cst_21 = arith.constant dense<0xFF800000> : vector<9xf32>
    %23 = vector.multi_reduction <maximumf>, %22, %cst_21 [1] : vector<9x9xf32> to vector<9xf32>
    %24 = vector.shape_cast %23 : vector<9xf32> to vector<9x1xf32>
    %25 = vector.broadcast %24 : vector<9x1xf32> to vector<9x9xf32>
    %26 = arith.subf %22, %25 : vector<9x9xf32>
    %27 = math.exp %26 : vector<9x9xf32>
    %cst_22 = arith.constant dense<0.000000e+00> : vector<9xf32>
    %28 = vector.multi_reduction <add>, %27, %cst_22 [1] : vector<9x9xf32> to vector<9xf32>
    %29 = vector.shape_cast %28 : vector<9xf32> to vector<9x1xf32>
    %30 = vector.broadcast %29 : vector<9x1xf32> to vector<9x9xf32>
    %31 = arith.divf %27, %30 : vector<9x9xf32>
    %cst_23 = arith.constant dense<0.000000e+00> : vector<9x128xf32>
    %32 = tpu.matmul %31, %15, %cst_23 {dimension_numbers = #tpu.dot_dimension_numbers<[1], [0], [0], [1], [0, 0, 1, 1], [], []>} : vector<9x9xf32>, vector<9x128xf32>, vector<9x128xf32> -> vector<9x128xf32>
    %c0_24 = arith.constant 0 : index
    %c0_25 = arith.constant 0 : index
    %c0_26 = arith.constant 0 : index
    %33 = vector.load %arg8[%c0_24, %c0_25, %c0_26] : memref<1x9x128xf32, #tpu.memory_space<vmem>>, vector<1x9x128xf32>
    %34 = vector.shape_cast %33 : vector<1x9x128xf32> to vector<9x128xf32>
    %35 = vector.shape_cast %32 : vector<9x128xf32> to vector<1x9x128xf32>
    tpu.vector_store %arg8[%c0_24, %c0_25, %c0_26], %35 {strides = array<i32>} : memref<1x9x128xf32, #tpu.memory_space<vmem>>, vector<1x9x128xf32>,
    return
  }
  func.func @transform_0(%arg0: i32) -> (i32, i32, i32) {
    %c0_i32 = arith.constant 0 : i32
    %c0_i32_0 = arith.constant 0 : i32
    %c0_i32_1 = arith.constant 0 : i32
    return %arg0, %c0_i32, %c0_i32_0 : i32, i32, i32
  }
  func.func @transform_1(%arg0: i32) -> (i32, i32) {
    %c0_i32 = arith.constant 0 : i32
    %c0_i32_0 = arith.constant 0 : i32
    %c0_i32_1 = arith.constant 0 : i32
    return %c0_i32, %c0_i32_0 : i32, i32
  }
  func.func @transform_2(%arg0: i32) -> (i32, i32) {
    %c0_i32 = arith.constant 0 : i32
    %c0_i32_0 = arith.constant 0 : i32
    %c0_i32_1 = arith.constant 0 : i32
    return %c0_i32, %c0_i32_0 : i32, i32
  }
  func.func @transform_3(%arg0: i32) -> (i32, i32) {
    %c0_i32 = arith.constant 0 : i32
    %c0_i32_0 = arith.constant 0 : i32
    %c0_i32_1 = arith.constant 0 : i32
    return %c0_i32, %c0_i32_0 : i32, i32
  }
  func.func @transform_4(%arg0: i32) -> (i32, i32, i32) {
    %c0_i32 = arith.constant 0 : i32
    %c0_i32_0 = arith.constant 0 : i32
    %c0_i32_1 = arith.constant 0 : i32
    return %arg0, %c0_i32, %c0_i32_0 : i32, i32, i32
  }
  func.func @transform_5(%arg0: i32) -> (i32, i32, i32) {
    %c0_i32 = arith.constant 0 : i32
    %c0_i32_0 = arith.constant 0 : i32
    %c0_i32_1 = arith.constant 0 : i32
    return %arg0, %c0_i32, %c0_i32_0 : i32, i32, i32
  }
  func.func @transform_6(%arg0: i32) -> (i32, i32, i32) {
    %c0_i32 = arith.constant 0 : i32
    %c0_i32_0 = arith.constant 0 : i32
    %c0_i32_1 = arith.constant 0 : i32
    return %arg0, %c0_i32, %c0_i32_0 : i32, i32, i32
  }
  func.func @transform_7(%arg0: i32) -> (i32, i32, i32) {
    %c0_i32 = arith.constant 0 : i32
    %c0_i32_0 = arith.constant 0 : i32
    %c0_i32_1 = arith.constant 0 : i32
    return %arg0, %c0_i32, %c0_i32_0 : i32, i32, i32
  }
}

</mosaic_0001>

<bundles_post_ra>
// kernel: tpu_custom_call.1
= control target key start
LH: loop header
LB: loop body
LE: loop exit
PB: predicated region body
PF: predicated region fallthrough
CT: control target
= control target key end

     0   :  { %12 = vsyncpa [#allocation3], 0  ;;  %s1461_s0 = inlined_call_operand.vmem [shape: f32[2,9,128], index: 0, kind: input, shape index: {}]   ;;  %s1462_s1 = inlined_call_operand.hbm [shape: f32[128,128], index: 1, kind: input, shape index: {}]   ;;  %s1463_s2 = inlined_call_operand.hbm [shape: f32[128,128], index: 2, kind: input, shape index: {}]   ;;  %s1464_s3 = inlined_call_operand.hbm [shape: f32[128,128], index: 3, kind: input, shape index: {}]   ;;  %s1465_s4 = inlined_call_operand.vmem [shape: f32[2,1,128], index: 4, kind: input, shape index: {}]   ;;  %s1466_s5 = inlined_call_operand.vmem [shape: f32[2,1,128], index: 5, kind: input, shape index: {}]   ;;  %s1467_s6 = inlined_call_operand.vmem [shape: f32[2,1,9], index: 6, kind: input, shape index: {}]   ;;  %s1468_s7 = inlined_call_operand.vmem [shape: f32[2,9,128], index: 7, kind: output, shape index: {}]  }
   0x1   :  { %13 = vsyncpa [#allocation5], 0  ;;  %s1356_s24 = smov 0  }
   0x2 LB: > { %s1362_s25 = sadd.s32 4294967295, %s1309_s24   ;;  %p964_p0 = scmp.ge.s32.totalorder %s1309_s24, 1  ;;  %s1309_s24 = sphi %s1356_s24, %s19_s24  }
   0x3   : > { %p217_p1 = scmp.lt.s32.totalorder %s1309_s24, 3  ;;  %p1190_p2 = scmp.eq.s32.totalorder %s1362_s25, 0 }
   0x4   : > { %s1311_s27 = smov [#allocation4]   ;;  %s1312_s29 = smov [#allocation2]  }
   0x5   : > { %p1367_p3 = pnand %p964_p0, %p217_p1  ;;  %s242_s28 = sshll.u32 %s1311_s27, 4  ;;  %s243_s28 = int_to_ptr.vmem [resolvable:$true] %s242_s28 }
   0x6   : > { %s229_s30 = sshll.u32 %s1312_s29, 4  ;;  %s1313_s9 = smov [#allocation6]   ;;  %s230_s30 = int_to_ptr.vmem [resolvable:$true] %s229_s30 }
   0x7   : > { %p1180_p4 = pneg %p1367_p3  ;;  %s255_s10 = sshll.u32 %s1313_s9, 4  ;;  %s1379_s10 = int_to_ptr.vmem [resolvable:$true] %s255_s10 }
   0x8   : > { %s1228_s11 = scalar_lea.vmem %s243_s28, 2048  ;;  %p1236_p10 = scmp.lt.s32.totalorder %s243_s28, %s243_s28 }
   0x9   : > { %p1375_p5 = pnand %p1190_p2, %p1180_p4  ;;  %p1229_p7 = scmp.ne.s32.totalorder %s243_s28, %s1228_s11 }
   0xa   : > { %p1237_p11 = scmp.lt.s32.totalorder %s1228_s11, %s1228_s11 }
   0xb   : > { %p1219_p6 = pneg %p1375_p5 }
   0xc   : > { %p1238_p12 = por %p1237_p11, %p1236_p10 }
   0xd   : > { %p1231_p8 = pnand %p1229_p7, %p1219_p6 }
   0xf   : > { %p1232_p9 = pneg %p1231_p8 }
  0x11   : > { %p1239_p13 = pnand %p1238_p12, %p1232_p9 }
  0x13   : > { %1242 = shalt.err (!%p1239_p13)
}
  0x14   : > { %s1314_s12 = smov 128   ;;  %s1315_s13 = smov 8  }
  0x15   : > { %1186 = dma.hbm_to_vmem [thread:$0]  (!%p1375_p5), %s1463_s2, 2048, %s243_s28, [#allocation5], %s1314_s12, %s1314_s12, %s1315_s13  }
  0x16   : > { %s1254_s16 = scalar_lea.vmem %s230_s30, 2048  ;;  %p1262_p7 = scmp.lt.s32.totalorder %s230_s30, %s230_s30 }
  0x17   : > { %p1255_p0 = scmp.ne.s32.totalorder %s230_s30, %s1254_s16  ;;  %p1263_p8 = scmp.lt.s32.totalorder %s1254_s16, %s1254_s16 }
  0x19   : > { %p1257_p1 = pnand %p1255_p0, %p1219_p6  ;;  %p1264_p10 = por %p1263_p8, %p1262_p7 }
  0x1b   : > { %p1258_p4 = pneg %p1257_p1 }
  0x1d   : > { %p1265_p9 = pnand %p1264_p10, %p1258_p4 }
  0x1f   : > { %1268 = shalt.err (!%p1265_p9)
}
  0x20   : > { %1183 = dma.hbm_to_vmem [thread:$0]  (!%p1375_p5), %s1462_s1, 2048, %s230_s30, [#allocation3], %s1314_s12, %s1314_s12, %s1315_s13  }
  0x21   : > { %s1280_s19 = scalar_lea.vmem %s1379_s10, 2048  ;;  %p1288_p0 = scmp.lt.s32.totalorder %s1379_s10, %s1379_s10 }
  0x22   : > { %p1281_p11 = scmp.ne.s32.totalorder %s1379_s10, %s1280_s19  ;;  %p1289_p1 = scmp.lt.s32.totalorder %s1280_s19, %s1280_s19 }
  0x24   : > { %p1283_p12 = pnand %p1281_p11, %p1219_p6  ;;  %p1290_p4 = por %p1289_p1, %p1288_p0 }
  0x26   : > { %p1284_p13 = pneg %p1283_p12 }
  0x28   : > { %p1291_p7 = pnand %p1290_p4, %p1284_p13 }
  0x2a   : > { %1294 = shalt.err (!%p1291_p7)
}
  0x2b   : > { %1189 = dma.hbm_to_vmem [thread:$0]  (!%p1375_p5), %s1464_s3, 2048, %s1379_s10, [#allocation5], %s1314_s12, %s1314_s12, %s1315_s13  }
  0x2c   : > { %297 = sbr.rel (%p1367_p3) target bundleno = 998 (0x3e6), region = 48 }
  0x31   : > { %1300 = dma.done.wait (%p1190_p2), [#allocation3], 2048  }
  0x32   : > { %1302 = vsyncadd (%p1190_p2), [#allocation3], 4294965248 }
  0x33   : > { %1304 = dma.done.wait (%p1190_p2), [#allocation5], 4096  }
  0x34   : > { %1306 = vsyncadd (%p1190_p2), [#allocation5], 4294963200  ;;  %v480_v0 = vld [vmem:[#allocation4 + $0x78] sm:$0xff]  ;;  %v479_v2 = vld [vmem:[#allocation4 + $0x70] sm:$0xff]  ;;  %p346_p2 = scmp.lt.s32.totalorder %s1362_s25, 1  ;;  %vm738_vm0 = vcmask 72704  }
  0x35   : > { %v382_v1 = vld [vmem:[#allocation2 + $0x78] sm:$0xff]  ;;  %1084 = vmatprep.subr.mxu1 %v480_v0  ;;  %v381_v3 = vld [vmem:[#allocation2 + $0x70] sm:$0xff]  ;;  %v478_v4 = vld [vmem:[#allocation4 + $0x68] sm:$0xff]  ;;  %vm742_vm1 = vcmask 65536   ;;  %vm768_vm2 = vcmask 1040384  }
  0x36   : > { %1049 = vmatprep.subr.mxu0 %v382_v1  ;;  %1085 = vmatpush3.msra.mxu1 %v480_v0  ;;  %v380_v5 = vld [vmem:[#allocation2 + $0x68] sm:$0xff]  ;;  %v477_v6 = vld [vmem:[#allocation4 + $0x60] sm:$0xff]  ;;  %v476_v8 = vld [vmem:[#allocation4 + $0x58] sm:$0xff]  ;;  %s1472_s25 = smov (!%p346_p2, %s1362_s25), 1 }
  0x37   : > { %1050 = vmatpush3.msra.mxu0 %v382_v1  ;;  %1086 = vmatprep.subr.mxu1 %v479_v2  ;;  %v379_v7 = vld [vmem:[#allocation2 + $0x60] sm:$0xff]  ;;  %v378_v9 = vld [vmem:[#allocation2 + $0x58] sm:$0xff]  ;;  %v475_v10 = vld [vmem:[#allocation4 + $0x50] sm:$0xff]  ;;  %s985_s22 = sshll.u32 %s1472_s25, 4  ;;  %s356_s30 = scalar_lea.vmem %s1466_s5, %s1472_s25 }
  0x38   : > { %1051 = vmatprep.subr.mxu0 %v381_v3  ;;  %1087 = vmatpush3.msra.mxu1 %v479_v2  ;;  %v377_v11 = vld [vmem:[#allocation2 + $0x50] sm:$0xff]  ;;  %v474_v12 = vld [vmem:[#allocation4 + $0x48] sm:$0xff]  ;;  %v473_v14 = vld [vmem:[#allocation4 + $0x40] sm:$0xff]  ;;  %s350_s27 = scalar_lea.vmem %s1461_s0, %s985_s22  ;;  %s353_s10 = scalar_lea.vmem %s1465_s4, %s1472_s25 }
  0x39   : > { %1052 = vmatpush3.msra.mxu0 %v381_v3  ;;  %1088 = vmatprep.subr.mxu1 %v478_v4  ;;  %v376_v13 = vld [vmem:[#allocation2 + $0x48] sm:$0xff]  ;;  %v375_v15 = vld [vmem:[#allocation2 + $0x40] sm:$0xff]  ;;  %v472_v16 = vld [vmem:[#allocation4 + $0x38] sm:$0xff]  ;;  %s359_s13 = scalar_lea.vmem %s1467_s6, %s1472_s25  ;;  %s364_s16 = scalar_lea.vmem %s1468_s7, %s985_s22 }
  0x3a   : > { %1053 = vmatprep.subr.mxu0 %v380_v5  ;;  %1089 = vmatpush3.msra.mxu1 %v478_v4  ;;  %v374_v17 = vld [vmem:[#allocation2 + $0x38] sm:$0xff]  ;;  %v471_v18 = vld [vmem:[#allocation4 + $0x30] sm:$0xff]  ;;  %v470_v20 = vld [vmem:[#allocation4 + $0x28] sm:$0xff] }
  0x3b   : > { %1054 = vmatpush3.msra.mxu0 %v380_v5  ;;  %1090 = vmatprep.subr.mxu1 %v477_v6  ;;  %v373_v19 = vld [vmem:[#allocation2 + $0x30] sm:$0xff]  ;;  %v372_v21 = vld [vmem:[#allocation2 + $0x28] sm:$0xff]  ;;  %v469_v22 = vld [vmem:[#allocation4 + $0x20] sm:$0xff] }
  0x3c   : > { %1055 = vmatprep.subr.mxu0 %v379_v7  ;;  %1091 = vmatpush3.msra.mxu1 %v477_v6  ;;  %v371_v23 = vld [vmem:[#allocation2 + $0x20] sm:$0xff]  ;;  %v468_v24 = vld [vmem:[#allocation4 + $0x18] sm:$0xff]  ;;  %v467_v26 = vld [vmem:[#allocation4 + $0x10] sm:$0xff] }
  0x3d   : > { %1056 = vmatpush3.msra.mxu0 %v379_v7  ;;  %1092 = vmatprep.subr.mxu1 %v476_v8  ;;  %v370_v25 = vld [vmem:[#allocation2 + $0x18] sm:$0xff]  ;;  %v369_v27 = vld [vmem:[#allocation2 + $0x10] sm:$0xff]  ;;  %v466_v28 = vld [vmem:[#allocation4 + $0x8] sm:$0xff] }
  0x3e   : > { %1057 = vmatprep.subr.mxu0 %v378_v9  ;;  %1093 = vmatpush3.msra.mxu1 %v476_v8  ;;  %v368_v29 = vld [vmem:[#allocation2 + $0x8] sm:$0xff]  ;;  %v465_v30 = vld [vmem:[#allocation4] sm:$0xff]  ;;  %v578_v46 = vld [vmem:[#allocation6 + $0x78] sm:$0xff] }
  0x3f   : > { %1058 = vmatpush3.msra.mxu0 %v378_v9  ;;  %1094 = vmatprep.subr.mxu1 %v475_v10  ;;  %v367_v31 = vld [vmem:[#allocation2] sm:$0xff]  ;;  %v1432_v33 = vld [vmem:[%s350_s27 + $0x8] sm:$0x1]  ;;  %v577_v47 = vld [vmem:[#allocation6 + $0x70] sm:$0xff] }
  0x40   : > { %1059 = vmatprep.subr.mxu0 %v377_v11  ;;  %1095 = vmatpush3.msra.mxu1 %v475_v10  ;;  %v365_v32 = vld [vmem:[%s350_s27] sm:$0xff]  ;;  %v576_v48 = vld [vmem:[#allocation6 + $0x68] sm:$0xff]  ;;  %v574_v50 = vld [vmem:[#allocation6 + $0x58] sm:$0xff] }
  0x41   : > { %1060 = vmatpush3.msra.mxu0 %v377_v11  ;;  %1096 = vmatprep.subr.mxu1 %v474_v12  ;;  %v978_v34 = vld [vmem:[%s356_s30] ss:$0 sm:$0xff]  ;;  %v573_v51 = vld [vmem:[#allocation6 + $0x50] sm:$0xff]  ;;  %v572_v52 = vld [vmem:[#allocation6 + $0x48] sm:$0xff] }
  0x42   : > { %1061 = vmatprep.subr.mxu0 %v376_v13  ;;  %1097 = vmatpush3.msra.mxu1 %v474_v12  ;;  %v977_v37 = vld [vmem:[%s353_s10] ss:$0 sm:$0xff]  ;;  %v570_v54 = vld [vmem:[#allocation6 + $0x38] sm:$0xff]  ;;  %v569_v55 = vld [vmem:[#allocation6 + $0x30] sm:$0xff] }
  0x43   : > { %1062 = vmatpush3.msra.mxu0 %v376_v13  ;;  %1098 = vmatprep.subr.mxu1 %v473_v14  ;;  %v575_v49 = vld [vmem:[#allocation6 + $0x60] sm:$0xff]  ;;  %v568_v56 = vld [vmem:[#allocation6 + $0x28] sm:$0xff]  ;;  %v566_v58 = vld [vmem:[#allocation6 + $0x18] sm:$0xff] }
  0x44   : > { %1063 = vmatprep.subr.mxu0 %v375_v15  ;;  %1099 = vmatpush3.msra.mxu1 %v473_v14  ;;  %v571_v53 = vld [vmem:[#allocation6 + $0x40] sm:$0xff]  ;;  %v565_v59 = vld [vmem:[#allocation6 + $0x10] sm:$0xff]  ;;  %v564_v60 = vld [vmem:[#allocation6 + $0x8] sm:$0xff] }
  0x45   : > { %1064 = vmatpush3.msra.mxu0 %v375_v15  ;;  %1100 = vmatprep.subr.mxu1 %v472_v16  ;;  %v567_v57 = vld [vmem:[#allocation6 + $0x20] sm:$0xff] }
  0x46   : > { %1065 = vmatprep.subr.mxu0 %v374_v17  ;;  %1101 = vmatpush3.msra.mxu1 %v472_v16  ;;  %v563_v61 = vld [vmem:[#allocation6] sm:$0xff] }
  0x47   : > { %1066 = vmatpush3.msra.mxu0 %v374_v17  ;;  %1102 = vmatprep.subr.mxu1 %v471_v18  ;;  %v979_v63 = vld [vmem:[%s359_s13] ss:$0 sm:$0xff] }
  0x48   : > { %1067 = vmatprep.subr.mxu0 %v373_v19  ;;  %1103 = vmatpush3.msra.mxu1 %v471_v18 }
  0x49   : > { %1068 = vmatpush3.msra.mxu0 %v373_v19  ;;  %1104 = vmatprep.subr.mxu1 %v470_v20 }
  0x4a   : > { %1069 = vmatprep.subr.mxu0 %v372_v21  ;;  %1105 = vmatpush3.msra.mxu1 %v470_v20 }
  0x4b   : > { %1070 = vmatpush3.msra.mxu0 %v372_v21  ;;  %1106 = vmatprep.subr.mxu1 %v469_v22 }
  0x4c   : > { %1071 = vmatprep.subr.mxu0 %v371_v23  ;;  %1107 = vmatpush3.msra.mxu1 %v469_v22 }
  0x4d   : > { %1072 = vmatpush3.msra.mxu0 %v371_v23  ;;  %1108 = vmatprep.subr.mxu1 %v468_v24 }
  0x4e   : > { %1073 = vmatprep.subr.mxu0 %v370_v25  ;;  %1109 = vmatpush3.msra.mxu1 %v468_v24 }
  0x4f   : > { %1074 = vmatpush3.msra.mxu0 %v370_v25  ;;  %1110 = vmatprep.subr.mxu1 %v467_v26 }
  0x50   : > { %1075 = vmatprep.subr.mxu0 %v369_v27  ;;  %1111 = vmatpush3.msra.mxu1 %v467_v26 }
  0x51   : > { %1076 = vmatpush3.msra.mxu0 %v369_v27  ;;  %1112 = vmatprep.subr.mxu1 %v466_v28 }
  0x52   : > { %1077 = vmatprep.subr.mxu0 %v368_v29  ;;  %1113 = vmatpush3.msra.mxu1 %v466_v28 }
  0x53   : > { %1078 = vmatpush3.msra.mxu0 %v368_v29  ;;  %1114 = vmatprep.subr.mxu1 %v465_v30 }
  0x54   : > { %1079 = vmatprep.subr.mxu0 %v367_v31  ;;  %1115 = vmatpush3.msra.mxu1 %v465_v30 }
  0x55   : > { %1116 = vmatprep.mubr.f32.mxu1 %v365_v32  ;;  %1080 = vmatpush3.msra.mxu0 %v367_v31 }
  0x56   : > { %1081 = vmatprep.mubr.f32.mxu0 %v365_v32  ;;  %1117 = vmatmul.mubr.f32.vlgmr.msra.gmra.mxu1 %v1432_v33 }
  0x57   : > { %1082 = vmatmul.mubr.f32.vlgmr.msra.gmra.mxu0 %v1432_v33  ;;  %1119 = vmatprep.subr.mxu0 %v578_v46 }
  0x58   : > { %1151 = vmatprep.mubr.f32.mxu0 %v365_v32  ;;  %1120 = vmatpush3.msra.mxu0 %v578_v46 }
  0x59   : > { %1121 = vmatprep.subr.mxu0 %v577_v47 }
  0x5a   : > { %1122 = vmatpush3.msra.mxu0 %v577_v47 }
  0x5b   : > { %1123 = vmatprep.subr.mxu0 %v576_v48 }
  0x5c   : > { %1124 = vmatpush3.msra.mxu0 %v576_v48 }
  0x5d   : > { %1125 = vmatprep.subr.mxu0 %v575_v49 }
  0x5e   : > { %1126 = vmatpush3.msra.mxu0 %v575_v49 }
  0x5f   : > { %1127 = vmatprep.subr.mxu0 %v574_v50 }
  0x60   : > { %1128 = vmatpush3.msra.mxu0 %v574_v50 }
  0x61   : > { %1129 = vmatprep.subr.mxu0 %v573_v51 }
  0x62   : > { %1130 = vmatpush3.msra.mxu0 %v573_v51 }
  0x63   : > { %1131 = vmatprep.subr.mxu0 %v572_v52 }
  0x64   : > { %1132 = vmatpush3.msra.mxu0 %v572_v52 }
  0x65   : > { %1133 = vmatprep.subr.mxu0 %v571_v53 }
  0x66   : > { %1134 = vmatpush3.msra.mxu0 %v571_v53 }
  0x67   : > { %1135 = vmatprep.subr.mxu0 %v570_v54 }
  0x68   : > { %1136 = vmatpush3.msra.mxu0 %v570_v54 }
  0x69   : > { %1137 = vmatprep.subr.mxu0 %v569_v55 }
  0x6a   : > { %1138 = vmatpush3.msra.mxu0 %v569_v55 }
  0x6b   : > { %1139 = vmatprep.subr.mxu0 %v568_v56 }
  0x6c   : > { %1140 = vmatpush3.msra.mxu0 %v568_v56 }
  0x6d   : > { %1141 = vmatprep.subr.mxu0 %v567_v57 }
  0x6e   : > { %1142 = vmatpush3.msra.mxu0 %v567_v57 }
  0x6f   : > { %1143 = vmatprep.subr.mxu0 %v566_v58 }
  0x70   : > { %1144 = vmatpush3.msra.mxu0 %v566_v58 }
  0x71   : > { %1145 = vmatprep.subr.mxu0 %v565_v59 }
  0x72   : > { %1146 = vmatpush3.msra.mxu0 %v565_v59 }
  0x73   : > { %1147 = vmatprep.subr.mxu0 %v564_v60 }
  0x74   : > { %1148 = vmatpush3.msra.mxu0 %v564_v60 }
  0x75   : > { %1149 = vmatprep.subr.mxu0 %v563_v61 }
  0x76   : > { %1150 = vmatpush3.msra.mxu0 %v563_v61 }
  0x77   : > { %1152 = vmatmul.mubr.f32.vlgmr.msra.gmra.mxu0 %v1432_v33 }
 0x116   : > { %v1118_v35 = vpop.f32.mrf.mxu1 }
 0x117   : > { %v1083_v36 = vpop.f32.mrf.mxu0  ;;  %v560_v38 = vadd.f32 %v1118_v35, %v978_v34 }
 0x118   : > { %v554_v39 = vpop.f32.mrf.mxu1  ;;  %v462_v43 = vadd.f32 %v1083_v36, %v977_v37 }
 0x119   : > { %v456_v40 = vpop.f32.mrf.mxu0  ;;  %v555_v41 = vadd.f32 %v978_v34, %v554_v39  ;;  %1154 = vmatprep.subr.mxu1 %v560_v38 }
 0x11a   : > { %v457_v42 = vadd.f32 %v977_v37, %v456_v40  ;;  %1155 = vmatpush3.xpose.msra.mxu1 %v560_v38  ;;  %v655_v45 = vmul.f32 0.088388346, %v462_v43 }
 0x11b   : > { %1156 = vmatprep.subr.mxu1 %v555_v41 }
 0x11c   : > { %v654_v44 = vmul.f32 0.088388346, %v457_v42 }
 0x11e   : > { %1158 = vmatprep.mubr.f32.mxu1 %v654_v44  ;;  %1157 = vmatpush3.xpose.msra.mxu1 %v555_v41 }
 0x121   : > { %1159 = vmatmul.mubr.f32.vlgmr.msra.gmra.mxu1 %v655_v45 }
 0x137   : > { %v1153_v15 = vpop.f32.mrf.mxu0 }
 0x138   : > { %1161 = vmatprep.subr.msk.mxu1 %vm768_vm2, %v1153_v15 }
 0x139   : > { %v645_v16 = vpop.f32.mrf.mxu0  ;;  %1162 = vmatpush3.msk.msra.mxu1 %vm768_vm2, %v1153_v15 }
 0x13a   : > { %1163 = vmatprep.subr.mxu1 %v645_v16 }
 0x13b   : > { %1164 = vmatpush3.msra.mxu1 %v645_v16 }
 0x1e1   : > { %v1160_v62 = vpop.f32.mrf.mxu1 }
 0x1e2   : > { %v735_v2 = vadd.f32 %v1160_v62, %v979_v63 }
 0x1e3   : > { %v729_v0 = vpop.f32.mrf.mxu1 }
 0x1e4   : > { %v730_v1 = vadd.f32 %v979_v63, %v729_v0  ;;  %v743_v4 = vsel %vm742_vm1, %v735_v2, -inf }
 0x1e6   : > { %v739_v3 = vsel %vm738_vm0, %v730_v1, -inf }
 0x1e7   : > { %740 = vmax.xlane.f32.xlu0 %v739_v3 }
 0x1eb   : > { %744 = vmax.xlane.f32.xlu0 %v743_v4 }
 0x270   : > { %v741_v5 = vpop.xlane.xlu0 %740 }
 0x271   : > { %v746_v6 = vsub.f32 %v730_v1, %v741_v5 }
 0x273   : > { %v748_v7 = vmul.f32 1.442695, %v746_v6 }
 0x274   : > { %v745_v8 = vpop.xlane.xlu0 %744 }
 0x275   : > { %1209 = vpow2.f32 %v748_v7  ;;  %v747_v9 = vsub.f32 %v735_v2, %v745_v8 }
 0x277   : > { %v750_v10 = vmul.f32 1.442695, %v747_v9 }
 0x279   : > { %1211 = vpow2.f32 %v750_v10 }
 0x282   : > { %v1210_v11 = vpop.eup %1209 }
 0x283   : > { %v752_v12 = vsel %vm738_vm0, %v1210_v11, 0.0 }
 0x284   : > { %753 = vadd.xlane.f32.xlu1 %v752_v12 }
 0x286   : > { %v1212_v13 = vpop.eup %1211 }
 0x287   : > { %v755_v14 = vsel %vm742_vm1, %v1212_v13, 0.0 }
 0x288   : > { %756 = vadd.xlane.f32.xlu1 %v755_v14 }
 0x30d   : > { %v754_v17 = vpop.xlane.xlu1 %753 }
 0x30e   : > { %1213 = vrcp.f32 %v754_v17 }
 0x311   : > { %v757_v18 = vpop.xlane.xlu1 %756 }
 0x312   : > { %1215 = vrcp.f32 %v757_v18 }
 0x31b   : > { %v1214_v19 = vpop.eup %1213 }
 0x31c   : > { %v759_v20 = vmul.f32 %v1214_v19, %v1210_v11 }
 0x31e   : > { %1165 = vmatprep.mubr.msk.f32.mxu1 %vm738_vm0, %v759_v20 }
 0x31f   : > { %v1216_v21 = vpop.eup %1215 }
 0x320   : > { %v761_v22 = vmul.f32 %v1216_v21, %v1212_v13 }
 0x322   : > { %1166 = vmatmul.mubr.msk.f32.vlgmr.msra.gmra.mxu1 %vm738_vm0, %v761_v22 }
 0x3e2   : > { %v1167_v23 = vpop.f32.mrf.mxu1 }
 0x3e3   : > { %848 = vst [vmem:[%s364_s16 + $0x8] sm:$0x1] %v1167_v23 }
 0x3e4   : > { %v838_v24 = vpop.f32.mrf.mxu1 }
 0x3e5   : > { %847 = vst [vmem:[%s364_s16] sm:$0xff] %v838_v24 }
 0x3e6 PF: > { %s19_s24 = sadd.s32 1, %s1309_s24  }
 0x3e7   : > { %p16_p3 = scmp.ge.s32.totalorder %s19_s24, 4  }
 0x3e9   :  { %18 = sbr.rel (!%p16_p3) target bundleno = 2 (0x2), region = 100 }
 0x3ee   :  { %870 = vsyncpa [#allocation3], 1 }
 0x3ef   :  { %872 = vsyncpa [#allocation3 + $0x1], 1 }
 0x3f0   :  { %873 = vsyncpa [#allocation5], 1 }

</bundles_post_ra>
